<compile_context>
chip_gen: v7x
topology: tpu7x:2x2x1
jax: 0.10.0
libtpu: 0.0.40
codegen_flags: <defaults>
</compile_context>

<pallas_src>
import functools

import jax
import jax.numpy as jnp
from jax.experimental import pallas as pl
from jax.experimental.pallas import tpu as pltpu


def _dice_kernel(pred_ref, tgt_ref, out_ref, inter_acc, den_acc, *,
                 smooth, n_total, num_classes):
    # pred_ref : (1, C, chunk)  input-dtype logits (VMEM tile)
    # tgt_ref  : (1, 1, chunk)  int32 labels
    # out_ref  : (1, 8, 128)    f32 per-sample loss (broadcast-filled)
    # inter_acc, den_acc : (1, 1) f32 VMEM accumulators
    k = pl.program_id(1)
    nk = pl.num_programs(1)

    @pl.when(k == 0)
    def _init():
        inter_acc[...] = jnp.zeros_like(inter_acc)
        den_acc[...] = jnp.zeros_like(den_acc)

    x = pred_ref[0].astype(jnp.float32)        # (C, chunk)
    labels = tgt_ref[0]                        # (1, chunk) int32
    c, chunk = x.shape

    # Mask for the (possibly padded) last chunk.
    col = jax.lax.broadcasted_iota(jnp.int32, (1, chunk), 1) + k * chunk
    valid = col < n_total                      # (1, chunk) bool

    # Unnormalized softmax + per-pixel normalizer.
    m = jnp.max(x, axis=0, keepdims=True)      # (1, chunk)
    e = jnp.exp(x - m)                         # (C, chunk)
    s = jnp.sum(e, axis=0, keepdims=True)      # (1, chunk)
    inv = pl.reciprocal(s)                     # exact; (1, chunk)

    # Fused one-hot: pick e at the label class (zero rows for out-of-range).
    class_ids = jax.lax.broadcasted_iota(jnp.int32, (c, chunk), 0)
    picked = jnp.sum(jnp.where(labels == class_ids, e, 0.0),
                     axis=0, keepdims=True)    # (1, chunk)

    zero = jnp.zeros_like(s)
    # sum(p * onehot)
    inter_part = jnp.sum(jnp.where(valid, picked * inv, zero), keepdims=True)
    # sum(p): per-pixel softmax sums to s * inv (== 1 up to rounding)
    p_part = jnp.sum(jnp.where(valid, s * inv, zero), keepdims=True)
    # sum(onehot): 1 per valid, in-range label
    label_ok = valid & (labels >= 0) & (labels < num_classes)
    t_part = jnp.sum(label_ok.astype(jnp.float32), keepdims=True)

    inter_acc[...] += inter_part
    den_acc[...] += p_part + t_part

    @pl.when(k == nk - 1)
    def _finalize():
        numer = 2.0 * inter_acc[...] + smooth
        denom = den_acc[...] + smooth
        loss = 1.0 - numer / denom                             # (1, 1)
        out_ref[...] = jnp.broadcast_to(loss.reshape(1, 1, 1), out_ref.shape)


def _pick_chunk(c, n):
    """Lane-dense spatial chunk sized for ~2 MiB f32 (C, chunk) working tiles."""
    if n <= 1024:
        return n                                # full spatial extent: always legal
    budget_elems = (2 * 1024 * 1024) // 4       # f32 elements per (C, chunk) temp
    chunk = min(n, max(128, budget_elems // max(c, 1)))
    chunk = max(128, (chunk // 128) * 128)      # multiple of 128 lanes when tiled
    return n if chunk >= n else chunk


def dice_loss(predict, target, smooth=1e-6, reduction="mean"):
    """predict: (B, C, H, W) logits (any float dtype); target: (B, H, W) or (B, 1, H, W) int labels."""
    b, c, h, w = predict.shape
    n = h * w

    # Keep the input dtype for the prediction DMA (halves HBM traffic for bf16);
    # upcast to f32 inside the kernel.
    pred = predict.reshape(b, c, n)
    tgt = jnp.squeeze(target).astype(jnp.int32).reshape(b, 1, n)

    chunk = _pick_chunk(c, n)
    num_chunks = pl.cdiv(n, chunk)

    out = pl.pallas_call(
        functools.partial(_dice_kernel, smooth=float(smooth), n_total=n,
                          num_classes=c),
        out_shape=jax.ShapeDtypeStruct((b, 8, 128), jnp.float32),
        grid_spec=pltpu.PrefetchScalarGridSpec(
            num_scalar_prefetch=0,
            grid=(b, num_chunks),
            in_specs=[
                pl.BlockSpec((1, c, chunk), lambda i, k: (i, 0, k)),
                pl.BlockSpec((1, 1, chunk), lambda i, k: (i, 0, k)),
            ],
            out_specs=pl.BlockSpec((1, 8, 128), lambda i, k: (i, 0, 0)),
            scratch_shapes=[
                pltpu.VMEM((1, 1), jnp.float32),   # intersection accumulator
                pltpu.VMEM((1, 1), jnp.float32),   # sum(p) + sum(onehot) accumulator
            ],
        ),
        compiler_params=pltpu.CompilerParams(
            dimension_semantics=("parallel", "arbitrary"),
        ),
    )(pred, tgt)

    per_sample = out[:, 0, 0]

    if reduction == "mean":
        return jnp.mean(per_sample)
    elif reduction == "sum":
        return jnp.sum(per_sample)
    elif reduction is None:
        return per_sample
    else:
        raise Exception("Unexpected reduction {}".format(reduction))


if __name__ == "__main__":
    key = jax.random.PRNGKey(0)
    k1, k2 = jax.random.split(key)

    B, C, H, W = 2, 4, 16, 16
    predict = jax.random.normal(k1, (B, C, H, W), dtype=jnp.float32)
    target = jax.random.randint(k2, (B, 1, H, W), 0, C, dtype=jnp.int32)

    loss = dice_loss(predict, target, smooth=1e-6, reduction="mean")
    jax.block_until_ready(loss)

    # quick sanity check against a pure-JAX reference
    def ref(predict, target):
        p = jax.nn.softmax(predict.astype(jnp.float32), axis=1)
        t = jax.nn.one_hot(jnp.squeeze(target), C, axis=1, dtype=jnp.float32)
        p = p.reshape(B, C, -1)
        t = t.reshape(B, C, -1)
        inter = jnp.sum(p * t, axis=(1, 2))
        num = 2.0 * inter + 1e-6
        den = jnp.sum(p, axis=(1, 2)) + jnp.sum(t, axis=(1, 2)) + 1e-6
        return jnp.mean(1.0 - num / den)

    expected = ref(predict, target)
    assert jnp.allclose(loss, expected, atol=1e-5, rtol=1e-5), (loss, expected)

    print("KERNEL_OK")
</pallas_src>

<mosaic_0001>
module attributes {stable_mosaic.version = 11 : i64} {
  func.func @_dice_kernel(%arg0: i32, %arg1: i32, %arg2: memref<1x4x256xf32, #tpu.memory_space<vmem>>, %arg3: memref<1x1x256xi32, #tpu.memory_space<vmem>>, %arg4: memref<1x8x128xf32, #tpu.memory_space<vmem>>, %arg5: memref<1x1xf32, #tpu.memory_space<vmem>>, %arg6: memref<1x1xf32, #tpu.memory_space<vmem>>) attributes {dimension_semantics = [#tpu.dimension_semantics<parallel>, #tpu.dimension_semantics<arbitrary>], iteration_bounds = array<i64: 2, 1>, scalar_prefetch = 0 : i64, scratch_operands = 2 : i64, tpu.core_type = #tpu.core_type<tc>, window_params = [{transform_indices = @transform_0, window_bounds = array<i64: 1, 4, 256>}, {transform_indices = @transform_1, window_bounds = array<i64: 1, 1, 256>}, {transform_indices = @transform_2, window_bounds = array<i64: 1, 8, 128>}]} {
    %c0_i32 = arith.constant 0 : i32
    %0 = arith.cmpi eq, %arg1, %c0_i32 : i32
    %1 = arith.extui %0 : i1 to i32
    %c0_i32_0 = arith.constant 0 : i32
    %2 = arith.cmpi ne, %1, %c0_i32_0 : i32
    scf.if %2 {
      %cst_25 = arith.constant 0.000000e+00 : f32
      %66 = vector.broadcast %cst_25 : f32 to vector<1x1xf32>
      %c0_26 = arith.constant 0 : index
      %c0_27 = arith.constant 0 : index
      %67 = vector.load %arg5[%c0_26, %c0_27] : memref<1x1xf32, #tpu.memory_space<vmem>>, vector<1x1xf32>
      tpu.vector_store %arg5[%c0_26, %c0_27], %66 {strides = array<i32>} : memref<1x1xf32, #tpu.memory_space<vmem>>, vector<1x1xf32>,
      %cst_28 = arith.constant 0.000000e+00 : f32
      %68 = vector.broadcast %cst_28 : f32 to vector<1x1xf32>
      %c0_29 = arith.constant 0 : index
      %c0_30 = arith.constant 0 : index
      %69 = vector.load %arg6[%c0_29, %c0_30] : memref<1x1xf32, #tpu.memory_space<vmem>>, vector<1x1xf32>
      tpu.vector_store %arg6[%c0_29, %c0_30], %68 {strides = array<i32>} : memref<1x1xf32, #tpu.memory_space<vmem>>, vector<1x1xf32>,
    } else {
    }
    %c0 = arith.constant 0 : index
    %c0_1 = arith.constant 0 : index
    %c0_2 = arith.constant 0 : index
    %3 = vector.load %arg2[%c0, %c0_1, %c0_2] : memref<1x4x256xf32, #tpu.memory_space<vmem>>, vector<1x4x256xf32>
    %4 = vector.shape_cast %3 : vector<1x4x256xf32> to vector<4x256xf32>
    %c0_3 = arith.constant 0 : index
    %c0_4 = arith.constant 0 : index
    %c0_5 = arith.constant 0 : index
    %5 = vector.load %arg3[%c0_3, %c0_4, %c0_5] : memref<1x1x256xi32, #tpu.memory_space<vmem>>, vector<1x1x256xi32>
    %6 = vector.shape_cast %5 : vector<1x1x256xi32> to vector<1x256xi32>
    %7 = tpu.iota {dimensions = array<i32: 1>} : vector<1x256xi32>
    %c256_i32 = arith.constant 256 : i32
    %8 = arith.muli %arg1, %c256_i32 : i32
    %9 = vector.broadcast %8 : i32 to vector<1x256xi32>
    %10 = arith.addi %7, %9 : vector<1x256xi32>
    %c256_i32_6 = arith.constant 256 : i32
    %11 = vector.broadcast %c256_i32_6 : i32 to vector<1x256xi32>
    %12 = arith.cmpi slt, %10, %11 : vector<1x256xi32>
    %cst = arith.constant dense<0xFF800000> : vector<256xf32>
    %13 = vector.multi_reduction <maximumf>, %4, %cst [0] : vector<4x256xf32> to vector<256xf32>
    %14 = vector.shape_cast %13 : vector<256xf32> to vector<1x256xf32>
    %15 = vector.broadcast %14 : vector<1x256xf32> to vector<4x256xf32>
    %16 = arith.subf %4, %15 : vector<4x256xf32>
    %17 = math.exp %16 : vector<4x256xf32>
    %cst_7 = arith.constant dense<0.000000e+00> : vector<256xf32>
    %18 = vector.multi_reduction <add>, %17, %cst_7 [0] : vector<4x256xf32> to vector<256xf32>
    %19 = vector.shape_cast %18 : vector<256xf32> to vector<1x256xf32>
    %20 = tpu.reciprocal %19 : vector<1x256xf32> -> vector<1x256xf32>
    %21 = tpu.iota {dimensions = array<i32: 0>} : vector<4x256xi32>
    %22 = vector.broadcast %6 : vector<1x256xi32> to vector<4x256xi32>
    %23 = arith.cmpi eq, %22, %21 : vector<4x256xi32>
    %cst_8 = arith.constant 0.000000e+00 : f32
    %24 = vector.broadcast %cst_8 : f32 to vector<4x256xf32>
    %25 = arith.select %23, %17, %24 : vector<4x256xi1>, vector<4x256xf32>
    %cst_9 = arith.constant dense<0.000000e+00> : vector<256xf32>
    %26 = vector.multi_reduction <add>, %25, %cst_9 [0] : vector<4x256xf32> to vector<256xf32>
    %27 = vector.shape_cast %26 : vector<256xf32> to vector<1x256xf32>
    %cst_10 = arith.constant 0.000000e+00 : f32
    %28 = vector.broadcast %cst_10 : f32 to vector<1x256xf32>
    %29 = arith.mulf %27, %20 : vector<1x256xf32>
    %30 = arith.select %12, %29, %28 : vector<1x256xi1>, vector<1x256xf32>
    %31 = vector.shape_cast %30 : vector<1x256xf32> to vector<1x1x256xf32>
    %cst_11 = arith.constant dense<0.000000e+00> : vector<1xf32>
    %32 = vector.multi_reduction <add>, %31, %cst_11 [1, 2] : vector<1x1x256xf32> to vector<1xf32>
    %33 = vector.shape_cast %32 : vector<1xf32> to vector<1x1x1xf32>
    %34 = vector.extract %33[0, 0, 0] : f32 from vector<1x1x1xf32>
    %35 = vector.broadcast %34 : f32 to vector<1x1xf32>
    %36 = arith.mulf %19, %20 : vector<1x256xf32>
    %37 = arith.select %12, %36, %28 : vector<1x256xi1>, vector<1x256xf32>
    %38 = vector.shape_cast %37 : vector<1x256xf32> to vector<1x1x256xf32>
    %cst_12 = arith.constant dense<0.000000e+00> : vector<1xf32>
    %39 = vector.multi_reduction <add>, %38, %cst_12 [1, 2] : vector<1x1x256xf32> to vector<1xf32>
    %40 = vector.shape_cast %39 : vector<1xf32> to vector<1x1x1xf32>
    %41 = vector.extract %40[0, 0, 0] : f32 from vector<1x1x1xf32>
    %42 = vector.broadcast %41 : f32 to vector<1x1xf32>
    %c0_i32_13 = arith.constant 0 : i32
    %43 = vector.broadcast %c0_i32_13 : i32 to vector<1x256xi32>
    %44 = arith.cmpi sge, %6, %43 : vector<1x256xi32>
    %45 = arith.andi %12, %44 : vector<1x256xi1>
    %c4_i32 = arith.constant 4 : i32
    %46 = vector.broadcast %c4_i32 : i32 to vector<1x256xi32>
    %47 = arith.cmpi slt, %6, %46 : vector<1x256xi32>
    %48 = arith.andi %45, %47 : vector<1x256xi1>
    %49 = arith.extui %48 : vector<1x256xi1> to vector<1x256xi32>
    %50 = arith.sitofp %49 : vector<1x256xi32> to vector<1x256xf32>
    %51 = vector.shape_cast %50 : vector<1x256xf32> to vector<1x1x256xf32>
    %cst_14 = arith.constant dense<0.000000e+00> : vector<1xf32>
    %52 = vector.multi_reduction <add>, %51, %cst_14 [1, 2] : vector<1x1x256xf32> to vector<1xf32>
    %53 = vector.shape_cast %52 : vector<1xf32> to vector<1x1x1xf32>
    %54 = vector.extract %53[0, 0, 0] : f32 from vector<1x1x1xf32>
    %55 = vector.broadcast %54 : f32 to vector<1x1xf32>
    %c0_15 = arith.constant 0 : index
    %c0_16 = arith.constant 0 : index
    %56 = vector.load %arg5[%c0_15, %c0_16] : memref<1x1xf32, #tpu.memory_space<vmem>>, vector<1x1xf32>
    %57 = arith.addf %56, %35 : vector<1x1xf32>
    %c0_17 = arith.constant 0 : index
    %c0_18 = arith.constant 0 : index
    %58 = vector.load %arg5[%c0_17, %c0_18] : memref<1x1xf32, #tpu.memory_space<vmem>>, vector<1x1xf32>
    tpu.vector_store %arg5[%c0_17, %c0_18], %57 {strides = array<i32>} : memref<1x1xf32, #tpu.memory_space<vmem>>, vector<1x1xf32>,
    %c0_19 = arith.constant 0 : index
    %c0_20 = arith.constant 0 : index
    %59 = vector.load %arg6[%c0_19, %c0_20] : memref<1x1xf32, #tpu.memory_space<vmem>>, vector<1x1xf32>
    %60 = arith.addf %42, %55 : vector<1x1xf32>
    %61 = arith.addf %59, %60 : vector<1x1xf32>
    %c0_21 = arith.constant 0 : index
    %c0_22 = arith.constant 0 : index
    %62 = vector.load %arg6[%c0_21, %c0_22] : memref<1x1xf32, #tpu.memory_space<vmem>>, vector<1x1xf32>
    tpu.vector_store %arg6[%c0_21, %c0_22], %61 {strides = array<i32>} : memref<1x1xf32, #tpu.memory_space<vmem>>, vector<1x1xf32>,
    %c0_i32_23 = arith.constant 0 : i32
    %63 = arith.cmpi eq, %arg1, %c0_i32_23 : i32
    %64 = arith.extui %63 : i1 to i32
    %c0_i32_24 = arith.constant 0 : i32
    %65 = arith.cmpi ne, %64, %c0_i32_24 : i32
    scf.if %65 {
      %c0_25 = arith.constant 0 : index
      %c0_26 = arith.constant 0 : index
      %66 = vector.load %arg5[%c0_25, %c0_26] : memref<1x1xf32, #tpu.memory_space<vmem>>, vector<1x1xf32>
      %cst_27 = arith.constant 2.000000e+00 : f32
      %67 = vector.broadcast %cst_27 : f32 to vector<1x1xf32>
      %68 = arith.mulf %67, %66 : vector<1x1xf32>
      %cst_28 = arith.constant 9.99999997E-7 : f32
      %69 = vector.broadcast %cst_28 : f32 to vector<1x1xf32>
      %70 = arith.addf %68, %69 : vector<1x1xf32>
      %c0_29 = arith.constant 0 : index
      %c0_30 = arith.constant 0 : index
      %71 = vector.load %arg6[%c0_29, %c0_30] : memref<1x1xf32, #tpu.memory_space<vmem>>, vector<1x1xf32>
      %cst_31 = arith.constant 9.99999997E-7 : f32
      %72 = vector.broadcast %cst_31 : f32 to vector<1x1xf32>
      %73 = arith.addf %71, %72 : vector<1x1xf32>
      %74 = arith.divf %70, %73 : vector<1x1xf32>
      %cst_32 = arith.constant 1.000000e+00 : f32
      %75 = vector.broadcast %cst_32 : f32 to vector<1x1xf32>
      %76 = arith.subf %75, %74 : vector<1x1xf32>
      %77 = vector.shape_cast %76 : vector<1x1xf32> to vector<1x1x1xf32>
      %78 = vector.shape_cast %77 : vector<1x1x1xf32> to vector<1x1x1xf32>
      %79 = vector.broadcast %78 : vector<1x1x1xf32> to vector<1x8x128xf32>
      %c0_33 = arith.constant 0 : index
      %c0_34 = arith.constant 0 : index
      %c0_35 = arith.constant 0 : index
      %80 = vector.load %arg4[%c0_33, %c0_34, %c0_35] : memref<1x8x128xf32, #tpu.memory_space<vmem>>, vector<1x8x128xf32>
      tpu.vector_store %arg4[%c0_33, %c0_34, %c0_35], %79 {strides = array<i32>} : memref<1x8x128xf32, #tpu.memory_space<vmem>>, vector<1x8x128xf32>,
    } else {
    }
    return
  }
  func.func @transform_0(%arg0: i32, %arg1: i32) -> (i32, i32, i32) {
    %c0_i32 = arith.constant 0 : i32
    %c0_i32_0 = arith.constant 0 : i32
    return %arg0, %c0_i32, %arg1 : i32, i32, i32
  }
  func.func @transform_1(%arg0: i32, %arg1: i32) -> (i32, i32, i32) {
    %c0_i32 = arith.constant 0 : i32
    %c0_i32_0 = arith.constant 0 : i32
    return %arg0, %c0_i32, %arg1 : i32, i32, i32
  }
  func.func @transform_2(%arg0: i32, %arg1: i32) -> (i32, i32, i32) {
    %c0_i32 = arith.constant 0 : i32
    %c0_i32_0 = arith.constant 0 : i32
    %c0_i32_1 = arith.constant 0 : i32
    return %arg0, %c0_i32, %c0_i32_0 : i32, i32, i32
  }
}

</mosaic_0001>

<bundles_post_ra>
// kernel: tpu_custom_call.1
= control target key start
LH: loop header
LB: loop body
LE: loop exit
PB: predicated region body
PF: predicated region fallthrough
CT: control target
= control target key end

     0   :  { %7 = vsyncpa [#allocation5], 0  ;;  %s1057_s0 = inlined_call_operand.hbm [shape: f32[2,4,256], index: 0, kind: input, shape index: {}]   ;;  %s1058_s1 = inlined_call_operand.hbm [shape: s32[2,1,256], index: 1, kind: input, shape index: {}]   ;;  %s1059_s2 = inlined_call_operand.hbm [shape: f32[2,8,128], index: 2, kind: output, shape index: {}]  }
   0x1   :  { %9 = vsyncpa [#allocation5 + $0x1], 0 }
   0x2   :  { %10 = vsyncpa [#allocation8], 0 }
   0x3   :  { %12 = vsyncpa [#allocation8 + $0x1], 0 }
   0x4   :  { %13 = vsyncpa [#allocation6], 0 }
   0x5   :  { %15 = vsyncpa [#allocation6 + $0x1], 0  ;;  %s816_s9 = smov 0   ;;  %s818_s10 = smov 0  }
   0x6   :  { %s820_s11 = smov 0   ;;  %s822_s12 = smov 0  }
   0x7   :  { %s824_s13 = smov 0   ;;  %s826_s14 = smov 0  }
   0x8 LB: > { %s540_s15 = sadd.s32 4294967295, %s794_s14   ;;  %s541_s16 = sadd.s32 4294967294, %s794_s14   ;;  %s794_s14 = sphi %s826_s14, %s21_s14   ;;  %s790_s13 = sphi %s824_s13, %s1079_s13   ;;  %s786_s12 = sphi %s822_s12, %s1078_s12   ;;  %s782_s11 = sphi %s820_s11, %s1077_s11   ;;  %s778_s10 = sphi %s818_s10, %s1076_s10   ;;  %s774_s9 = sphi %s816_s9, %s1075_s9  }
   0x9   : > { %s33_s17 = sadd.s32 1, %s790_s13  ;;  %s42_s18 = sadd.s32 1, %s782_s11 }
   0xa   : > { %p35_p0 = scmp.ge.s32.totalorder %s33_s17, 2  ;;  %p49_p1 = scmp.ne.s32.totalorder %s782_s11, %s778_s10 }
   0xb   : > { %p50_p2 = scmp.eq.s32.totalorder %s794_s14, 0  ;;  %p55_p3 = scmp.ne.s32.totalorder %s778_s10, %s774_s9 }
   0xc   : > { %s1081_s17 = smov (%p35_p0, %s33_s17), 0  ;;  %p56_p5 = scmp.eq.s32.totalorder %s540_s15, 0 }
   0xd   : > { %p857_p4 = por %p50_p2, %p49_p1  ;;  %s37_s20 = ssub.s32 %s790_s13, %s1081_s17 }
   0xe   : > { %p107_p6 = scmp.eq.s32.totalorder %s540_s15, 1  ;;  %p40_p7 = scmp.eq.s32.totalorder %s37_s20, 0 }
   0xf   : > { %p863_p8 = por %p56_p5, %p55_p3  ;;  %p113_p10 = scmp.eq.s32.totalorder %s541_s16, 1 }
  0x10   : > { %p867_p9 = por %p107_p6, %p49_p1  ;;  %p585_p13 = scmp.lt.s32.totalorder %s794_s14, 2 }
  0x11   : > { %s1063_s21 = scalar_select %p863_p8, 1, 0 }
  0x12   : > { %s1064_s22 = scalar_select %p867_p9, 1, 0 }
  0x13   : > { %s872_s23 = scalar_select %p40_p7, %s782_s11, %s42_s18  }
  0x14   : > { %p874_p11 = por %p113_p10, %p55_p3  ;;  %s881_s25 = sand.u32 1, %s782_s11  }
  0x15   : > { %s544_s26 = sshll.u32 %s881_s25, 3  ;;  %s560_s27 = sshll.u32 %s790_s13, 7 }
  0x16   : > { %s1065_s24 = scalar_select %p874_p11, 1, 0 }
  0x17   : > { %s888_s30 = scalar_lea.hbm %s1057_s0, %s560_s27  ;;  %s137_s3 = scalar_lea.vmem [#allocation4], %s544_s26 }
  0x18   : > { %s147_s4 = sshll.u32 %s137_s3, 4  ;;  %p894_p0 = pnand %p585_p13, %p857_p4  ;;  %s890_s4 = int_to_ptr.vmem [resolvable:$true] %s147_s4 }
  0x19   : > { %s134_s6 = scalar_lea.sflag [#allocation5], %s881_s25  ;;  %s648_s7 = scalar_lea.hbm %s888_s30, 128 }
  0x1a   : > { %p649_p3 = scmp.ne.s32.totalorder %s888_s30, %s648_s7  ;;  %p650_p5 = pneg %p894_p0 }
  0x1b   : > { %s653_s16 = scalar_lea.hbm %s1057_s0, 256  ;;  %p654_p4 = scmp.lt.u32.totalorder %s888_s30, %s1057_s0 }
  0x1c   : > { %p651_p6 = pnand %p650_p5, %p649_p3  ;;  %p655_p10 = scmp.lt.u32.totalorder %s653_s16, %s648_s7 }
  0x1d   : > { %p657_p12 = scmp.lt.u32.totalorder %s648_s7, %s888_s30 }
  0x1e   : > { %p652_p7 = pneg %p651_p6  ;;  %p656_p13 = por %p655_p10, %p654_p4 }
  0x20   : > { %p658_p1 = por %p657_p12, %p656_p13 }
  0x22   : > { %p659_p2 = pnand %p658_p1, %p652_p7 }
  0x24   : > { %662 = shalt.err (!%p659_p2)
}
  0x25   : > { %s663_s20 = scalar_lea.vmem %s890_s4, 128  ;;  %s796_s26 = smov [#allocation4]  }
  0x26   : > { %p664_p3 = scmp.ne.s32.totalorder %s890_s4, %s663_s20  ;;  %s668_s27 = sshll.u32 %s796_s26, 4  ;;  %s669_s27 = int_to_ptr.vmem [resolvable:$false] %s668_s27 }
  0x27   : > { %s670_s28 = scalar_lea.vmem %s669_s27, 256  ;;  %p671_p9 = scmp.lt.s32.totalorder %s890_s4, %s669_s27 }
  0x28   : > { %p666_p6 = pnand %p664_p3, %p650_p5  ;;  %p672_p4 = scmp.lt.s32.totalorder %s670_s28, %s663_s20 }
  0x2a   : > { %p667_p11 = pneg %p666_p6  ;;  %p673_p10 = por %p672_p4, %p671_p9 }
  0x2c   : > { %p674_p12 = pnand %p673_p10, %p667_p11 }
  0x2e   : > { %677 = shalt.err (!%p674_p12)
}
  0x2f   : > { %577 = dma.hbm_to_vmem [thread:$0]  (!%p894_p0), %s888_s30, 128, %s890_s4, %s134_s6  }
  0x30   : > { %p1067_p1 = scmp.lt.s32.totalorder %s794_s14, 3  ;;  %p1068_p2 = scmp.ge.s32.totalorder %s794_s14, 1 }
  0x31   : > { %s547_s3 = sshll.u32 %s881_s25, 1  ;;  %s561_s7 = sshll.u32 %s790_s13, 5 }
  0x32   : > { %p930_p7 = pnand %p1068_p2, %p1067_p1  ;;  %s939_s16 = scalar_lea.hbm %s1058_s1, %s561_s7 }
  0x33   : > { %s158_s18 = scalar_lea.vmem [#allocation7], %s547_s3  ;;  %s155_s30 = scalar_lea.sflag [#allocation8], %s881_s25 }
  0x34   : > { %s1069_s29 = scalar_select %p930_p7, 1, 0 }
  0x35   : > { %s168_s19 = sshll.u32 %s158_s18, 4  ;;  %s678_s4 = scalar_lea.hbm %s939_s16, 32  ;;  %s169_s19 = int_to_ptr.vmem [resolvable:$true] %s168_s19 }
  0x36   : > { %p679_p9 = scmp.ne.s32.totalorder %s939_s16, %s678_s4  ;;  %s683_s26 = scalar_lea.hbm %s1058_s1, 64 }
  0x37   : > { %p684_p3 = scmp.lt.u32.totalorder %s939_s16, %s1058_s1  ;;  %p685_p6 = scmp.lt.u32.totalorder %s683_s26, %s678_s4 }
  0x38   : > { %p681_p11 = pnand %p679_p9, %p650_p5  ;;  %p687_p10 = scmp.lt.u32.totalorder %s678_s4, %s939_s16 }
  0x39   : > { %p686_p4 = por %p685_p6, %p684_p3 }
  0x3a   : > { %p682_p13 = pneg %p681_p11 }
  0x3b   : > { %p688_p12 = por %p687_p10, %p686_p4 }
  0x3d   : > { %p689_p1 = pnand %p688_p12, %p682_p13 }
  0x3f   : > { %692 = shalt.err (!%p689_p1)
}
  0x40   : > { %s693_s25 = scalar_lea.vmem %s169_s19, 32  ;;  %s797_s3 = smov [#allocation7]  }
  0x41   : > { %p694_p2 = scmp.ne.s32.totalorder %s169_s19, %s693_s25  ;;  %s698_s7 = sshll.u32 %s797_s3, 4  ;;  %s699_s7 = int_to_ptr.vmem [resolvable:$false] %s698_s7 }
  0x42   : > { %s700_s8 = scalar_lea.vmem %s699_s7, 64  ;;  %p701_p8 = scmp.lt.s32.totalorder %s169_s19, %s699_s7 }
  0x43   : > { %p696_p9 = pnand %p694_p2, %p650_p5  ;;  %p702_p7 = scmp.lt.s32.totalorder %s700_s8, %s693_s25 }
  0x45   : > { %p697_p11 = pneg %p696_p9  ;;  %p703_p3 = por %p702_p7, %p701_p8 }
  0x47   : > { %p704_p6 = pnand %p703_p3, %p697_p11 }
  0x49   : > { %707 = shalt.err (!%p704_p6)
}
  0x4a   : > { %580 = dma.hbm_to_vmem [thread:$0]  (!%p894_p0), %s939_s16, 32, %s169_s19, %s155_s30  }
  0x4b   : > { %p1070_p13 = scmp.ne.s32.totalorder %s1069_s29, 0 }
  0x4c   : > { %s964_s15 = sand.u32 (!%p1070_p13), 1, %s778_s10   ;;  %p1071_p8 = scmp.ne.s32.totalorder (!%p1070_p13), %s1063_s21, 0 }
  0x4d   : > { %177 = sbr.rel (%p1070_p13) target bundleno = 536 (0x218), region = 28  ;;  %s551_s18 = sshll.u32 (!%p1070_p13), %s964_s15, 3 }
  0x4e   : > { %s180_s4 = scalar_lea.sflag (!%p1070_p13), [#allocation5], %s964_s15  ;;  %s183_s6 = scalar_lea.vmem (!%p1070_p13), [#allocation4], %s551_s18 }
  0x54   : > { %761 = dma.done.wait (%p1071_p8), %s180_s4, 128  }
  0x55   : > { %763 = vsyncadd (%p1071_p8), %s180_s4, 4294967168  ;;  %s552_s5 = sshll.u32 %s964_s15, 1  ;;  %s189_s29 = scalar_lea.sflag [#allocation8], %s964_s15 }
  0x56   : > { %s192_s16 = scalar_lea.vmem [#allocation7], %s552_s5 }
  0x57   : > { %765 = dma.done.wait (%p1071_p8), %s189_s29, 32  }
  0x58   : > { %767 = vsyncadd (%p1071_p8), %s189_s29, 4294967264  ;;  %vm224_vm0 = vcmask 0   ;;  %v282_v0 = vlaneseq  ;;  %v798_v1 = vmov 0.0   ;;  %v799_v2 = vmov 0   ;;  %v228_v4 = vld [vmem:[%s192_s16] sm:$0x3] }
  0x59   : > { %225 = vst.msk [vmem:[#allocation2] sm:$0x1] %vm224_vm0, %v798_v1  ;;  %226 = vst.msk [vmem:[#allocation3] sm:$0x1] %vm224_vm0, %v798_v1  ;;  %637 = vset.pattern.permute.xlu1 %v799_v2  ;;  %638 = vset.pattern.permute.xlu0 %v799_v2  ;;  %vm241_vm1 = vcmask 1043456   ;;  %v227_v6 = vld [vmem:[%s183_s6] sm:$0xff] }
  0x5a   : > { %v283_v3 = vshrl.u32 %v282_v0, 7  ;;  %vm345_vm2 = vcmp.ge.s32.totalorder %v228_v4, 0  ;;  %vm359_vm3 = vcmp.lt.s32.totalorder %v228_v4, 4  ;;  %v239_v8 = vcombine.high %v227_v6, %v227_v6  ;;  %s217_s20 = scalar_lea.vmem [#allocation9], %s551_s18  ;;  %s557_s27 = sshll.u32 %s786_s12, 7 }
  0x5b   : > { %v346_v9 = vsel %vm345_vm2, 1, %v799_v2  ;;  %v360_v10 = vsel %vm359_vm3, 1, %v799_v2  ;;  %v242_v11 = vsel %vm241_vm1, %v227_v6, -inf  ;;  %vm314_vm4 = vcmask 1040384   ;;  %s433_s26 = sshll.u32 %s217_s20, 4  ;;  %s1010_s3 = scalar_lea.hbm %s1059_s2, %s557_s27  ;;  %s1005_s26 = int_to_ptr.vmem [resolvable:$true] %s433_s26 }
  0x5c   : > { %v982_v5 = vsub.s32 0, %v283_v3  ;;  %v290_v7 = vsub.s32 1, %v283_v3  ;;  %v243_v16 = vrot.slane %v242_v11, 4  ;;  %v249_v17 = vsel %vm241_vm1, %v239_v8, -inf  ;;  %s420_s7 = scalar_lea.sflag [#allocation6], %s964_s15  ;;  %s708_s8 = scalar_lea.vmem %s1005_s26, 128 }
  0x5d   : > { %v250_v19 = vrot.slane %v249_v17, 4  ;;  %p709_p0 = scmp.ne.s32.totalorder %s1005_s26, %s708_s8  ;;  %p1072_p5 = scmp.ne.s32.totalorder %s1064_s22, 0 }
  0x5e   : > { %v350_v12 = vrot.slane %v346_v9, %v982_v5  ;;  %v354_v13 = vrot.slane %v346_v9, %v290_v7  ;;  %v364_v14 = vrot.slane %v360_v10, %v982_v5  ;;  %v368_v15 = vrot.slane %v360_v10, %v290_v7  ;;  %s800_s18 = smov [#allocation9]  }
  0x5f   : > { %v244_v18 = vmax.f32 %v242_v11, %v243_v16  ;;  %v251_v24 = vmax.f32 %v249_v17, %v250_v19  ;;  %v287_v37 = vrot.slane %v228_v4, %v982_v5  ;;  %v291_v38 = vrot.slane %v228_v4, %v290_v7  ;;  %p710_p7 = pnand %p709_p0, %p1072_p5  ;;  %s712_s12 = sshll.u32 %s800_s18, 4  ;;  %s713_s12 = int_to_ptr.vmem [resolvable:$false] %s712_s12 }
  0x60   : > { %vm355_vm5 = vcmp.ne.s32.totalorder %v350_v12, 0  ;;  %vm356_vm6 = vcmp.ne.s32.totalorder %v354_v13, 0  ;;  %vm369_vm7 = vcmp.ne.s32.totalorder %v364_v14, 0  ;;  %vm370_vm8 = vcmp.ne.s32.totalorder %v368_v15, 0  ;;  %s714_s4 = scalar_lea.vmem %s713_s12, 256  ;;  %p715_p10 = scmp.lt.s32.totalorder %s1005_s26, %s713_s12 }
  0x61   : > { %vm371_vm9 = vmand %vm355_vm5, %vm369_vm7  ;;  %v245_v23 = vrot.slane %v244_v18, 2  ;;  %v252_v28 = vrot.slane %v251_v24, 2  ;;  %vm292_vm11 = vcmp.eq.s32.totalorder %v287_v37, %v283_v3  ;;  %vm293_vm12 = vcmp.eq.s32.totalorder %v291_v38, %v283_v3  ;;  %p711_p4 = pneg %p710_p7  ;;  %p716_p12 = scmp.lt.s32.totalorder %s714_s4, %s708_s8 }
  0x62   : > { %vm372_vm10 = vmand %vm356_vm6, %vm370_vm8  ;;  %v554_v20 = vsel %vm371_vm9, 1.0, %v798_v1 }
  0x63   : > { %v555_v21 = vsel %vm372_vm10, 1.0, %v798_v1  ;;  %v377_v22 = vsel %vm314_vm4, %v554_v20, 0.0  ;;  %v246_v27 = vmax.f32 %v244_v18, %v245_v23  ;;  %v253_v30 = vmax.f32 %v251_v24, %v252_v28  ;;  %p717_p1 = por %p716_p12, %p715_p10 }
  0x64   : > { %v378_v25 = vsel %vm314_vm4, %v555_v21, 0.0 }
  0x65   : > { %v379_v26 = vadd.f32 %v378_v25, %v377_v22  ;;  %v247_v29 = vrot.slane %v246_v27, 1  ;;  %v254_v32 = vrot.slane %v253_v30, 1  ;;  %p718_p2 = pnand %p717_p1, %p711_p4 }
  0x67   : > { %380 = vadd.xlane.f32.xlu1 %v379_v26  ;;  %v248_v31 = vmax.f32 %v246_v27, %v247_v29  ;;  %v255_v33 = vmax.f32 %v253_v30, %v254_v32 }
  0x69   : > { %v258_v34 = vcombine.low %v248_v31, %v255_v33 }
  0x6b   : > { %v260_v35 = vsub.f32 %v227_v6, %v258_v34 }
  0x6d   : > { %v261_v36 = vmul.f32 1.442695, %v260_v35 }
  0x6f   : > { %640 = vpow2.f32 %v261_v36 }
  0x79   : > { %v641_v39 = vpop.eup %640 }
  0x7a   : > { %v264_v40 = vcombine.high %v641_v39, %v641_v39  ;;  %v266_v41 = vsel %vm241_vm1, %v641_v39, 0.0  ;;  %v294_v42 = vsel %vm292_vm11, %v641_v39, 0.0 }
  0x7b   : > { %v267_v43 = vrot.slane %v266_v41, 4  ;;  %v296_v44 = vsel %vm241_vm1, %v294_v42, 0.0 }
  0x7c   : > { %v273_v45 = vsel %vm241_vm1, %v264_v40, 0.0  ;;  %v295_v46 = vsel %vm293_vm12, %v264_v40, 0.0  ;;  %v297_v47 = vrot.slane %v296_v44, 4 }
  0x7d   : > { %v268_v48 = vadd.f32 %v267_v43, %v266_v41  ;;  %v274_v49 = vrot.slane %v273_v45, 4  ;;  %v303_v50 = vsel %vm241_vm1, %v295_v46, 0.0  ;;  %v390_v41 = vld [vmem:[#allocation2] sm:$0x1]  ;;  %v394_v46 = vld [vmem:[#allocation3] sm:$0x1] }
  0x7e   : > { %v298_v51 = vadd.f32 %v297_v47, %v296_v44  ;;  %v304_v52 = vrot.slane %v303_v50, 4 }
  0x7f   : > { %v269_v53 = vrot.slane %v268_v48, 2  ;;  %v275_v54 = vadd.f32 %v274_v49, %v273_v45 }
  0x80   : > { %v305_v55 = vadd.f32 %v304_v52, %v303_v50  ;;  %v299_v58 = vrot.slane %v298_v51, 2 }
  0x81   : > { %v270_v56 = vadd.f32 %v269_v53, %v268_v48  ;;  %v276_v57 = vrot.slane %v275_v54, 2 }
  0x82   : > { %v306_v61 = vrot.slane %v305_v55, 2  ;;  %v300_v0 = vadd.f32 %v299_v58, %v298_v51 }
  0x83   : > { %v271_v59 = vrot.slane %v270_v56, 1  ;;  %v277_v60 = vadd.f32 %v276_v57, %v275_v54 }
  0x84   : > { %v307_v2 = vadd.f32 %v306_v61, %v305_v55  ;;  %v301_v3 = vrot.slane %v300_v0, 1 }
  0x85   : > { %v272_v62 = vadd.f32 %v271_v59, %v270_v56  ;;  %v278_v63 = vrot.slane %v277_v60, 1 }
  0x86   : > { %v308_v4 = vrot.slane %v307_v2, 1  ;;  %v302_v6 = vadd.f32 %v301_v3, %v300_v0 }
  0x87   : > { %v279_v1 = vadd.f32 %v278_v63, %v277_v60  ;;  %642 = vrcp.f32 %v272_v62 }
  0x88   : > { %v309_v7 = vadd.f32 %v308_v4, %v307_v2 }
  0x89   : > { %644 = vrcp.f32 %v279_v1 }
  0x91   : > { %v643_v8 = vpop.eup %642 }
  0x92   : > { %v310_v9 = vmul.f32 %v643_v8, %v302_v6  ;;  %v328_v10 = vmul.f32 %v643_v8, %v272_v62 }
  0x93   : > { %v645_v11 = vpop.eup %644 }
  0x94   : > { %v311_v12 = vmul.f32 %v645_v11, %v309_v7  ;;  %v315_v13 = vsel %vm314_vm4, %v310_v9, 0.0  ;;  %v329_v14 = vmul.f32 %v645_v11, %v279_v1  ;;  %v332_v16 = vsel %vm314_vm4, %v328_v10, 0.0 }
  0x96   : > { %v316_v15 = vsel %vm314_vm4, %v311_v12, 0.0  ;;  %v333_v17 = vsel %vm314_vm4, %v329_v14, 0.0 }
  0x97   : > { %v317_v18 = vadd.f32 %v316_v15, %v315_v13  ;;  %v334_v19 = vadd.f32 %v333_v17, %v332_v16 }
  0x99   : > { %318 = vadd.xlane.f32.xlu0 %v317_v18 }
  0x9d   : > { %335 = vadd.xlane.f32.xlu0 %v334_v19 }
  0xf4   : > { %v381_v20 = vpop.xlane.xlu1 %380 }
  0xf5   : > { %v382_v21 = vrot.slane %v381_v20, 4 }
  0xf7   : > { %v383_v22 = vadd.f32 %v382_v21, %v381_v20 }
  0xf9   : > { %v384_v26 = vrot.slane %v383_v22, 2 }
  0xfb   : > { %v385_v32 = vadd.f32 %v384_v26, %v383_v22 }
  0xfd   : > { %v386_v37 = vrot.slane %v385_v32, 1 }
  0xff   : > { %v387_v40 = vadd.f32 %v386_v37, %v385_v32 }
 0x126   : > { %v319_v23 = vpop.xlane.xlu0 %318 }
 0x127   : > { %v320_v24 = vrot.slane %v319_v23, 4 }
 0x129   : > { %v321_v25 = vadd.f32 %v320_v24, %v319_v23 }
 0x12a   : > { %v336_v27 = vpop.xlane.xlu0 %335 }
 0x12b   : > { %v322_v28 = vrot.slane %v321_v25, 2  ;;  %v337_v29 = vrot.slane %v336_v27, 4 }
 0x12d   : > { %v338_v30 = vadd.f32 %v337_v29, %v336_v27  ;;  %v323_v31 = vadd.f32 %v322_v28, %v321_v25 }
 0x12f   : > { %v339_v33 = vrot.slane %v338_v30, 2  ;;  %v324_v34 = vrot.slane %v323_v31, 1 }
 0x131   : > { %v340_v35 = vadd.f32 %v339_v33, %v338_v30  ;;  %v325_v36 = vadd.f32 %v324_v34, %v323_v31 }
 0x133   : > { %562 = vpush %v325_v36  ;;  %v341_v38 = vrot.slane %v340_v35, 1 }
 0x135   : > { %v342_v39 = vadd.f32 %v341_v38, %v340_v35 }
 0x137   : > { %564 = vpush %v342_v39 }
 0x138   : > { %566 = vpush %v387_v40 }
 0x164   : > { %s563_s21 = spop %562 }
 0x165   : > { %v327_v42 = vstv %s563_s21 }
 0x166   : > { %v391_v43 = vadd.f32 %v390_v41, %v327_v42 }
 0x168   : > { %393 = vst.msk [vmem:[#allocation2] sm:$0x1] %vm224_vm0, %v391_v43  ;;  %s565_s19 = spop %564 }
 0x169   : > { %v344_v44 = vstv %s565_s19  ;;  %s567_s30 = spop %566 }
 0x16a   : > { %v389_v45 = vstv %s567_s30 }
 0x16b   : > { %v395_v47 = vadd.f32 %v389_v45, %v344_v44 }
 0x16d   : > { %v396_v48 = vadd.f32 %v395_v47, %v394_v46 }
 0x16f   : > { %397 = vst.msk [vmem:[#allocation3] sm:$0x1] %vm224_vm0, %v396_v48  ;;  %v401_v51 = vld [vmem:[#allocation2] sm:$0x1] }
 0x170   : > { %v402_v52 = vmul.f32 2.0, %v401_v51 }
 0x172   : > { %v403_v53 = vadd.f32 1e-06, %v402_v52 }
 0x176   : > { %v404_v49 = vld [vmem:[#allocation3] sm:$0x1] }
 0x177   : > { %v405_v50 = vadd.f32 1e-06, %v404_v49 }
 0x179   : > { %646 = vrcp.f32 %v405_v50 }
 0x183   : > { %v647_v54 = vpop.eup %646 }
 0x184   : > { %v407_v55 = vmul.f32 %v647_v54, %v403_v53 }
 0x186   : > { %v408_v56 = vsub.f32 1.0, %v407_v55 }
 0x188   : > { %v413_v57 = vrot.slane %v408_v56, %v982_v5 }
 0x18a   : > { %415 = vperm.xlu1 %637, %v413_v57  }
 0x209   : > { %v416_v58 = vpop.permute.xlu1 %415 }
 0x20a   : > { %418 = vst [vmem:[%s217_s20] sm:$0xff] %v416_v58 }
 0x20b   : > { %721 = shalt.err (!%p718_p2)
}
 0x20c   : > { %s722_s15 = scalar_lea.hbm %s1010_s3, 128  ;;  %s726_s29 = scalar_lea.hbm %s1059_s2, 256 }
 0x20d   : > { %p723_p9 = scmp.ne.s32.totalorder %s1010_s3, %s722_s15  ;;  %p727_p6 = scmp.lt.u32.totalorder %s1010_s3, %s1059_s2 }
 0x20e   : > { %p728_p13 = scmp.lt.u32.totalorder %s726_s29, %s722_s15  ;;  %p730_p0 = scmp.lt.u32.totalorder %s722_s15, %s1010_s3 }
 0x20f   : > { %p724_p11 = pnand %p723_p9, %p1072_p5 }
 0x210   : > { %p729_p8 = por %p728_p13, %p727_p6 }
 0x211   : > { %p725_p3 = pneg %p724_p11 }
 0x212   : > { %p731_p7 = por %p730_p0, %p729_p8 }
 0x214   : > { %p732_p4 = pnand %p731_p7, %p725_p3 }
 0x216   : > { %735 = shalt.err (!%p732_p4)
}
 0x217   : > { %572 = dma.vmem_to_hbm [thread:$0]  (%p1072_p5), %s1005_s26, 128, %s1010_s3, %s420_s7  }
 0x218 PF: > { %s445_s19 = sand.u32 1, %s774_s9   ;;  %p1073_p10 = scmp.ne.s32.totalorder %s1065_s24, 0 }
 0x219   : > { %p1074_p12 = scmp.ge.s32.totalorder %s794_s14, 2  ;;  %s446_s30 = scalar_lea.sflag [#allocation6], %s445_s19 }
 0x21b   : > { %p582_p1 = pnand %p1074_p12, %p1073_p10 }
 0x21d   : > { %769 = dma.done.wait (!%p582_p1), %s446_s30, 128  }
 0x21e   : > { %771 = vsyncadd (!%p582_p1), %s446_s30, 4294967168  ;;  %s21_s14 = sadd.s32 1, %s794_s14   ;;  %s1075_s9 = smov %s778_s10 }
 0x21f   : > { %p18_p2 = scmp.ge.s32.totalorder %s21_s14, 4   ;;  %s1076_s10 = smov %s782_s11 }
 0x220   : > { %s1077_s11 = smov %s872_s23  ;;  %s1078_s12 = smov %s790_s13 }
 0x221   : > { %s1079_s13 = smov %s1081_s17  ;;  %20 = sbr.rel (!%p18_p2) target bundleno = 8 (0x8), region = 94 }
 0x228   :  { %451 = vsyncpa [#allocation5], 1 }
 0x229   :  { %453 = vsyncpa [#allocation5 + $0x1], 1 }
 0x22a   :  { %454 = vsyncpa [#allocation8], 1 }
 0x22b   :  { %456 = vsyncpa [#allocation8 + $0x1], 1 }
 0x22c   :  { %457 = vsyncpa [#allocation6], 1 }
 0x22d   :  { %459 = vsyncpa [#allocation6 + $0x1], 1 }

</bundles_post_ra>
